<compile_context>
chip_gen: v5e
topology: v5e:2x2
jax: 0.10.0
libtpu: 0.0.40
codegen_flags: <defaults>
</compile_context>

<pallas_src>
import jax
import jax.numpy as jnp
from jax.experimental import pallas as pl
from jax.experimental.pallas import tpu as pltpu


# ----------------------------------------------------------------------------
# Single fused Pallas kernel: embeddings -> GNN -> both heads -> bbox epilogue
# ----------------------------------------------------------------------------
def _fused_forward_kernel(rect_ref, cls_ref,
                          pos_w_ref, pos_b_ref, type_tbl_ref,
                          gnn_w_ref, gnn_b_ref,
                          w1_ref, b1_ref, w2_ref, b2_ref, w3_ref, b3_ref,
                          logits_ref, bbox_ref, cent_ref):
    rect = rect_ref[...]                                             # (N, 4) f32

    # --- embedding sum -------------------------------------------------------
    # PosEmbedder stand-in: relu(rect @ W + b)
    pos_emb = jnp.dot(rect, pos_w_ref[...], preferred_element_type=jnp.float32)
    pos_emb = jnp.maximum(pos_emb + pos_b_ref[...], 0.0)             # (N, 32)

    # TypeEmbedder: embedding lookup as one_hot(classes) @ table on the MXU.
    n = cls_ref.shape[0]
    num_types = type_tbl_ref.shape[0]
    onehot = (jax.lax.broadcasted_iota(jnp.int32, (n, num_types), 1)
              == cls_ref[...]).astype(jnp.float32)                   # (N, 8)
    type_emb = jnp.dot(onehot, type_tbl_ref[...],
                       preferred_element_type=jnp.float32)           # (N, 32)

    x = pos_emb + type_emb
    # TODO(synk): ImageEmbedder (cfg.remove_img=False path) depends on an external
    # CNN definition; not reproducible here.

    # --- GNN -----------------------------------------------------------------
    # TODO(synk): cfg.gnn_fn.gnn_type / GPSLayer are config-external; stand-in is a
    # single linear+relu with in_dim == out_dim (edges / node_indices unused).
    g = jnp.dot(x, gnn_w_ref[...], preferred_element_type=jnp.float32)
    g = jnp.maximum(g + gnn_b_ref[...], 0.0)                         # (N, 32)

    # --- cls_fn + loc_fn heads, fused ----------------------------------------
    # layer 1: concatenated weights -> 128-lane output (one full vreg lane width)
    h1 = jnp.dot(g, w1_ref[...], preferred_element_type=jnp.float32) + b1_ref[...]
    h1 = jnp.maximum(h1, 0.0)                                        # (N, 128)
    # layer 2: block-diagonal weights (cls | loc stay independent)
    h2 = jnp.dot(h1, w2_ref[...], preferred_element_type=jnp.float32) + b2_ref[...]
    h2 = jnp.maximum(h2, 0.0)                                        # (N, 64)
    # layer 3: block-diagonal, no activation -> [logits(2) | loc_params(4)]
    h3 = jnp.dot(h2, w3_ref[...], preferred_element_type=jnp.float32) + b3_ref[...]

    logits = h3[:, 0:2]
    loc_params = h3[:, 2:6]

    # --- process_output_data ('offset_based_on_layer') epilogue --------------
    bboxes = loc_params + rect
    logits_ref[...] = logits
    bbox_ref[...] = bboxes
    cent_ref[...] = bboxes[:, 0:2] + 0.5 * bboxes[:, 2:4]


def fused_network_call(layer_rect, classes, fp):
    """One pallas_call for the whole forward. Returns (logits, bboxes, centroids)."""
    N = layer_rect.shape[0]
    embed = fp["pos_w"].shape[1]
    nt = fp["type_table"].shape[0]
    d1 = fp["w1"].shape[1]
    d2 = fp["w2"].shape[1]
    d3 = fp["w3"].shape[1]

    operands = (
        layer_rect.astype(jnp.float32),
        classes.reshape(N, 1).astype(jnp.int32),
        fp["pos_w"], fp["pos_b"], fp["type_table"],
        fp["gnn_w"], fp["gnn_b"],
        fp["w1"], fp["b1"], fp["w2"], fp["b2"], fp["w3"], fp["b3"],
    )

    flops = 2 * N * (4 * embed + nt * embed + embed * embed
                     + embed * d1 + d1 * d2 + d2 * d3)
    bytes_accessed = 4 * (sum(int(o.size) for o in operands)
                          + N * (2 + 4 + 2))

    return pl.pallas_call(
        _fused_forward_kernel,
        out_shape=(
            jax.ShapeDtypeStruct((N, 2), jnp.float32),   # logits
            jax.ShapeDtypeStruct((N, 4), jnp.float32),   # bboxes (absolute)
            jax.ShapeDtypeStruct((N, 2), jnp.float32),   # centroids
        ),
        cost_estimate=pl.CostEstimate(flops=flops, transcendentals=0,
                                      bytes_accessed=bytes_accessed),
    )(*operands)


# ----------------------------------------------------------------------------
# Parameter construction (deterministic, synthetic)
# ----------------------------------------------------------------------------
def _init_linear(key, din, dout):
    kw, kb = jax.random.split(key)
    scale = 1.0 / jnp.sqrt(jnp.float32(din))
    w = jax.random.uniform(kw, (din, dout), jnp.float32, -scale, scale)
    b = jax.random.uniform(kb, (dout,), jnp.float32, -scale, scale)
    return w, b


def make_classifier_params(key, in_dim, latent_dims, classes, act="relu"):
    """Mirrors Classifier.make(): hidden FC layers with act, final FC with no act/norm."""
    layers = []
    d = in_dim
    dims = list(latent_dims) + [classes]
    acts = [act] * len(latent_dims) + [""]
    for dout, a in zip(dims, acts):
        key, sub = jax.random.split(key)
        w, b = _init_linear(sub, d, dout)
        layers.append((w, b, a))
        d = dout
    # TODO(synk): cfg.norm_type (batch/layer norm inside make_fully_connected_layer)
    # is config-external; omitted here (norm_type = '').
    return layers


def make_network_params(key, embed_dim=32, num_types=8, latent_dims=(64, 32),
                        num_classes=2, loc_out=4):
    keys = jax.random.split(key, 6)
    params = {}
    params["pos_w"], params["pos_b"] = _init_linear(keys[0], 4, embed_dim)
    params["type_table"] = 0.1 * jax.random.normal(keys[1], (num_types, embed_dim),
                                                   jnp.float32)
    params["gnn_w"], params["gnn_b"] = _init_linear(keys[2], embed_dim, embed_dim)
    params["cls_layers"] = make_classifier_params(keys[3], embed_dim, latent_dims,
                                                  num_classes, act="relu")
    params["loc_layers"] = make_classifier_params(keys[4], embed_dim, latent_dims,
                                                  loc_out, act="relu")
    return params


def fuse_head_params(params):
    """Pack both Classifier heads into fused (layer1 concat, layers 2/3 block-diag)
    weights, and reshape biases to (1, D) for in-kernel broadcasting. Math is
    identical to applying the two heads independently."""
    (cw1, cb1, _), (cw2, cb2, _), (cw3, cb3, _) = params["cls_layers"]
    (lw1, lb1, _), (lw2, lb2, _), (lw3, lb3, _) = params["loc_layers"]

    d1c, d1l = cw1.shape[1], lw1.shape[1]          # 64, 64
    d2c, d2l = cw2.shape[1], lw2.shape[1]          # 32, 32
    oc, ol = cw3.shape[1], lw3.shape[1]            # 2, 4

    w1 = jnp.concatenate([cw1, lw1], axis=1)                        # (32, 128)
    b1 = jnp.concatenate([cb1, lb1])[None, :]                       # (1, 128)

    w2 = jnp.zeros((d1c + d1l, d2c + d2l), jnp.float32)
    w2 = w2.at[:d1c, :d2c].set(cw2).at[d1c:, d2c:].set(lw2)          # (128, 64)
    b2 = jnp.concatenate([cb2, lb2])[None, :]                       # (1, 64)

    w3 = jnp.zeros((d2c + d2l, oc + ol), jnp.float32)
    w3 = w3.at[:d2c, :oc].set(cw3).at[d2c:, oc:].set(lw3)            # (64, 6)
    b3 = jnp.concatenate([cb3, lb3])[None, :]                       # (1, 6)

    return {
        "pos_w": params["pos_w"], "pos_b": params["pos_b"][None, :],
        "type_table": params["type_table"],
        "gnn_w": params["gnn_w"], "gnn_b": params["gnn_b"][None, :],
        "w1": w1, "b1": b1, "w2": w2, "b2": b2, "w3": w3, "b3": b3,
    }


# ----------------------------------------------------------------------------
# Network forward (mirrors Network.forward structure)
# ----------------------------------------------------------------------------
@jax.jit
def network_forward(fused_params, layer_rect, edges, classes, labels, bboxes_gt):
    # edges / node_indices are unused by the GNN stand-in (see TODO inside kernel).
    del edges

    logits, bboxes, centroids = fused_network_call(layer_rect, classes, fused_params)

    confidence = None      # loc_type == 'classifier' -> no confidence head
    voting_offset = None   # no 'voting' in gnn_type

    # --- loss (default path: no confidence, non-anchor) ----------------------
    # TODO(synk): exact cls/reg loss fns (make_classifier_loss / make_regression_loss)
    # and their cfg.*.weight values are external; using cross-entropy + L1 with
    # unit weights.
    log_p = jax.nn.log_softmax(logits, axis=-1)
    cls_loss = -jnp.mean(jnp.take_along_axis(log_p, labels[:, None], axis=1))

    # Masked L1 over rows with label == 1 (mirrors boolean-index + mean in PyTorch).
    mask = (labels == 1).astype(jnp.float32)[:, None]
    cnt = jnp.maximum(jnp.sum(mask), 1.0)
    bboxes_tgt = bboxes_gt + layer_rect                     # gt absolute boxes
    tgt_center = bboxes_tgt[:, 0:2] + bboxes_tgt[:, 2:4] * 0.5
    # predicted absolute boxes vs gt absolute boxes (same coordinate frame)
    reg_loss = jnp.sum(jnp.abs(bboxes - bboxes_tgt) * mask) / (cnt * 4.0)
    center_reg_loss = jnp.sum(jnp.abs(tgt_center - centroids) * mask) / (cnt * 2.0)

    loss = cls_loss + reg_loss + center_reg_loss
    loss_stats = {
        "cls_loss": cls_loss,
        "reg_loss": reg_loss,
        "center_reg_loss": 1000.0 * center_reg_loss,
        "loss": loss,
    }

    return (logits, centroids, bboxes, confidence, voting_offset), loss, loss_stats


# ----------------------------------------------------------------------------
if __name__ == "__main__":
    key = jax.random.PRNGKey(0)
    k_param, k_rect, k_edge, k_cls, k_lab, k_box = jax.random.split(key, 6)

    N, E, EMBED = 64, 128, 32
    params = make_network_params(k_param, embed_dim=EMBED)
    fused_params = fuse_head_params(params)

    layer_rect = jax.random.uniform(k_rect, (N, 4), jnp.float32)
    edges = jax.random.randint(k_edge, (2, E), 0, N, jnp.int32)
    classes = jax.random.randint(k_cls, (N,), 0, 8, jnp.int32)
    labels = jax.random.randint(k_lab, (N,), 0, 2, jnp.int32)
    # gt offsets are zero where label == 0 (matches the assert in Network.loss)
    bboxes_gt = jax.random.uniform(k_box, (N, 4), jnp.float32) * labels[:, None].astype(
        jnp.float32
    )

    (out, loss, stats) = network_forward(fused_params, layer_rect, edges, classes,
                                         labels, bboxes_gt)
    logits, centroids, bboxes, confidence, voting_offset = out
    jax.block_until_ready((logits, centroids, bboxes, loss))

    assert logits.shape == (N, 2)
    assert centroids.shape == (N, 2)
    assert bboxes.shape == (N, 4)
    assert confidence is None and voting_offset is None
    assert bool(jnp.isfinite(loss))
    print("KERNEL_OK")
</pallas_src>

<mosaic_0001>
module attributes {stable_mosaic.version = 11 : i64} {
  func.func @_fused_forward_kernel(%arg0: memref<64x4xf32, #tpu.memory_space<vmem>>, %arg1: memref<64x1xi32, #tpu.memory_space<vmem>>, %arg2: memref<4x32xf32, #tpu.memory_space<vmem>>, %arg3: memref<1x32xf32, #tpu.memory_space<vmem>>, %arg4: memref<8x32xf32, #tpu.memory_space<vmem>>, %arg5: memref<32x32xf32, #tpu.memory_space<vmem>>, %arg6: memref<1x32xf32, #tpu.memory_space<vmem>>, %arg7: memref<32x128xf32, #tpu.memory_space<vmem>>, %arg8: memref<1x128xf32, #tpu.memory_space<vmem>>, %arg9: memref<128x64xf32, #tpu.memory_space<vmem>>, %arg10: memref<1x64xf32, #tpu.memory_space<vmem>>, %arg11: memref<64x6xf32, #tpu.memory_space<vmem>>, %arg12: memref<1x6xf32, #tpu.memory_space<vmem>>, %arg13: memref<64x2xf32, #tpu.memory_space<vmem>>, %arg14: memref<64x4xf32, #tpu.memory_space<vmem>>, %arg15: memref<64x2xf32, #tpu.memory_space<vmem>>) attributes {dimension_semantics = [], scalar_prefetch = 0 : i64, scratch_operands = 0 : i64, tpu.core_type = #tpu.core_type<tc>} {
    %c0 = arith.constant 0 : index
    %c0_0 = arith.constant 0 : index
    %0 = vector.load %arg0[%c0, %c0_0] : memref<64x4xf32, #tpu.memory_space<vmem>>, vector<64x4xf32>
    %c0_1 = arith.constant 0 : index
    %c0_2 = arith.constant 0 : index
    %1 = vector.load %arg2[%c0_1, %c0_2] : memref<4x32xf32, #tpu.memory_space<vmem>>, vector<4x32xf32>
    %cst = arith.constant dense<0.000000e+00> : vector<64x32xf32>
    %2 = tpu.matmul %0, %1, %cst {dimension_numbers = #tpu.dot_dimension_numbers<[1], [0], [0], [1], [0, 0, 1, 1], [], []>} : vector<64x4xf32>, vector<4x32xf32>, vector<64x32xf32> -> vector<64x32xf32>
    %c0_3 = arith.constant 0 : index
    %c0_4 = arith.constant 0 : index
    %3 = vector.load %arg3[%c0_3, %c0_4] : memref<1x32xf32, #tpu.memory_space<vmem>>, vector<1x32xf32>
    %4 = vector.broadcast %3 : vector<1x32xf32> to vector<64x32xf32>
    %5 = arith.addf %2, %4 : vector<64x32xf32>
    %cst_5 = arith.constant 0.000000e+00 : f32
    %6 = vector.broadcast %cst_5 : f32 to vector<64x32xf32>
    %7 = arith.maximumf %5, %6 : vector<64x32xf32>
    %8 = tpu.iota {dimensions = array<i32: 1>} : vector<64x8xi32>
    %c0_6 = arith.constant 0 : index
    %c0_7 = arith.constant 0 : index
    %9 = vector.load %arg1[%c0_6, %c0_7] : memref<64x1xi32, #tpu.memory_space<vmem>>, vector<64x1xi32>
    %10 = vector.broadcast %9 : vector<64x1xi32> to vector<64x8xi32>
    %11 = arith.cmpi eq, %8, %10 : vector<64x8xi32>
    %12 = arith.extui %11 : vector<64x8xi1> to vector<64x8xi32>
    %13 = arith.sitofp %12 : vector<64x8xi32> to vector<64x8xf32>
    %c0_8 = arith.constant 0 : index
    %c0_9 = arith.constant 0 : index
    %14 = vector.load %arg4[%c0_8, %c0_9] : memref<8x32xf32, #tpu.memory_space<vmem>>, vector<8x32xf32>
    %cst_10 = arith.constant dense<0.000000e+00> : vector<64x32xf32>
    %15 = tpu.matmul %13, %14, %cst_10 {dimension_numbers = #tpu.dot_dimension_numbers<[1], [0], [0], [1], [0, 0, 1, 1], [], []>} : vector<64x8xf32>, vector<8x32xf32>, vector<64x32xf32> -> vector<64x32xf32>
    %16 = arith.addf %7, %15 : vector<64x32xf32>
    %c0_11 = arith.constant 0 : index
    %c0_12 = arith.constant 0 : index
    %17 = vector.load %arg5[%c0_11, %c0_12] : memref<32x32xf32, #tpu.memory_space<vmem>>, vector<32x32xf32>
    %cst_13 = arith.constant dense<0.000000e+00> : vector<64x32xf32>
    %18 = tpu.matmul %16, %17, %cst_13 {dimension_numbers = #tpu.dot_dimension_numbers<[1], [0], [0], [1], [0, 0, 1, 1], [], []>} : vector<64x32xf32>, vector<32x32xf32>, vector<64x32xf32> -> vector<64x32xf32>
    %c0_14 = arith.constant 0 : index
    %c0_15 = arith.constant 0 : index
    %19 = vector.load %arg6[%c0_14, %c0_15] : memref<1x32xf32, #tpu.memory_space<vmem>>, vector<1x32xf32>
    %20 = vector.broadcast %19 : vector<1x32xf32> to vector<64x32xf32>
    %21 = arith.addf %18, %20 : vector<64x32xf32>
    %cst_16 = arith.constant 0.000000e+00 : f32
    %22 = vector.broadcast %cst_16 : f32 to vector<64x32xf32>
    %23 = arith.maximumf %21, %22 : vector<64x32xf32>
    %c0_17 = arith.constant 0 : index
    %c0_18 = arith.constant 0 : index
    %24 = vector.load %arg7[%c0_17, %c0_18] : memref<32x128xf32, #tpu.memory_space<vmem>>, vector<32x128xf32>
    %cst_19 = arith.constant dense<0.000000e+00> : vector<64x128xf32>
    %25 = tpu.matmul %23, %24, %cst_19 {dimension_numbers = #tpu.dot_dimension_numbers<[1], [0], [0], [1], [0, 0, 1, 1], [], []>} : vector<64x32xf32>, vector<32x128xf32>, vector<64x128xf32> -> vector<64x128xf32>
    %c0_20 = arith.constant 0 : index
    %c0_21 = arith.constant 0 : index
    %26 = vector.load %arg8[%c0_20, %c0_21] : memref<1x128xf32, #tpu.memory_space<vmem>>, vector<1x128xf32>
    %27 = vector.broadcast %26 : vector<1x128xf32> to vector<64x128xf32>
    %28 = arith.addf %25, %27 : vector<64x128xf32>
    %cst_22 = arith.constant 0.000000e+00 : f32
    %29 = vector.broadcast %cst_22 : f32 to vector<64x128xf32>
    %30 = arith.maximumf %28, %29 : vector<64x128xf32>
    %c0_23 = arith.constant 0 : index
    %c0_24 = arith.constant 0 : index
    %31 = vector.load %arg9[%c0_23, %c0_24] : memref<128x64xf32, #tpu.memory_space<vmem>>, vector<128x64xf32>
    %cst_25 = arith.constant dense<0.000000e+00> : vector<64x64xf32>
    %32 = tpu.matmul %30, %31, %cst_25 {dimension_numbers = #tpu.dot_dimension_numbers<[1], [0], [0], [1], [0, 0, 1, 1], [], []>} : vector<64x128xf32>, vector<128x64xf32>, vector<64x64xf32> -> vector<64x64xf32>
    %c0_26 = arith.constant 0 : index
    %c0_27 = arith.constant 0 : index
    %33 = vector.load %arg10[%c0_26, %c0_27] : memref<1x64xf32, #tpu.memory_space<vmem>>, vector<1x64xf32>
    %34 = vector.broadcast %33 : vector<1x64xf32> to vector<64x64xf32>
    %35 = arith.addf %32, %34 : vector<64x64xf32>
    %cst_28 = arith.constant 0.000000e+00 : f32
    %36 = vector.broadcast %cst_28 : f32 to vector<64x64xf32>
    %37 = arith.maximumf %35, %36 : vector<64x64xf32>
    %c0_29 = arith.constant 0 : index
    %c0_30 = arith.constant 0 : index
    %38 = vector.load %arg11[%c0_29, %c0_30] : memref<64x6xf32, #tpu.memory_space<vmem>>, vector<64x6xf32>
    %cst_31 = arith.constant dense<0.000000e+00> : vector<64x6xf32>
    %39 = tpu.matmul %37, %38, %cst_31 {dimension_numbers = #tpu.dot_dimension_numbers<[1], [0], [0], [1], [0, 0, 1, 1], [], []>} : vector<64x64xf32>, vector<64x6xf32>, vector<64x6xf32> -> vector<64x6xf32>
    %c0_32 = arith.constant 0 : index
    %c0_33 = arith.constant 0 : index
    %40 = vector.load %arg12[%c0_32, %c0_33] : memref<1x6xf32, #tpu.memory_space<vmem>>, vector<1x6xf32>
    %41 = vector.broadcast %40 : vector<1x6xf32> to vector<64x6xf32>
    %42 = arith.addf %39, %41 : vector<64x6xf32>
    %43 = vector.extract_strided_slice %42 {offsets = [0, 0], sizes = [64, 2], strides = [1, 1]} : vector<64x6xf32> to vector<64x2xf32>
    %44 = vector.extract_strided_slice %42 {offsets = [0, 2], sizes = [64, 4], strides = [1, 1]} : vector<64x6xf32> to vector<64x4xf32>
    %45 = arith.addf %44, %0 : vector<64x4xf32>
    %c0_34 = arith.constant 0 : index
    %c0_35 = arith.constant 0 : index
    %46 = vector.load %arg13[%c0_34, %c0_35] : memref<64x2xf32, #tpu.memory_space<vmem>>, vector<64x2xf32>
    tpu.vector_store %arg13[%c0_34, %c0_35], %43 {strides = array<i32>} : memref<64x2xf32, #tpu.memory_space<vmem>>, vector<64x2xf32>,
    %c0_36 = arith.constant 0 : index
    %c0_37 = arith.constant 0 : index
    %47 = vector.load %arg14[%c0_36, %c0_37] : memref<64x4xf32, #tpu.memory_space<vmem>>, vector<64x4xf32>
    tpu.vector_store %arg14[%c0_36, %c0_37], %45 {strides = array<i32>} : memref<64x4xf32, #tpu.memory_space<vmem>>, vector<64x4xf32>,
    %48 = vector.extract_strided_slice %45 {offsets = [0, 0], sizes = [64, 2], strides = [1, 1]} : vector<64x4xf32> to vector<64x2xf32>
    %49 = vector.extract_strided_slice %45 {offsets = [0, 2], sizes = [64, 2], strides = [1, 1]} : vector<64x4xf32> to vector<64x2xf32>
    %cst_38 = arith.constant 5.000000e-01 : f32
    %50 = vector.broadcast %cst_38 : f32 to vector<64x2xf32>
    %51 = arith.mulf %50, %49 : vector<64x2xf32>
    %52 = arith.addf %48, %51 : vector<64x2xf32>
    %c0_39 = arith.constant 0 : index
    %c0_40 = arith.constant 0 : index
    %53 = vector.load %arg15[%c0_39, %c0_40] : memref<64x2xf32, #tpu.memory_space<vmem>>, vector<64x2xf32>
    tpu.vector_store %arg15[%c0_39, %c0_40], %52 {strides = array<i32>} : memref<64x2xf32, #tpu.memory_space<vmem>>, vector<64x2xf32>,
    return
  }
}

</mosaic_0001>

<bundles_post_ra>
// kernel: network_forward.1
= control target key start
LH: loop header
LB: loop body
LE: loop exit
PB: predicated region body
PF: predicated region fallthrough
CT: control target
= control target key end

     0   :  { %v825_v0 = vmov 0   ;;  %vm85_vm0 = vcmask 1043456   ;;  %vm60_vm1 = vcmask 31744   ;;  %v138_v13 = vlaneseq  ;;  %s1279_s1 = inlined_call_operand.vmem [shape: s32[64,1], index: 1, kind: input, shape index: {}]   ;;  %s1280_s2 = inlined_call_operand.vmem [shape: f32[4,32], index: 2, kind: input, shape index: {}]   ;;  %s1281_s0 = inlined_call_operand.vmem [shape: f32[64,4], index: 0, kind: input, shape index: {}]   ;;  %s1282_s3 = inlined_call_operand.vmem [shape: f32[1,32], index: 3, kind: input, shape index: {}]   ;;  %s1283_s4 = inlined_call_operand.vmem [shape: f32[8,32], index: 4, kind: input, shape index: {}]   ;;  %s1284_s5 = inlined_call_operand.vmem [shape: f32[32,32], index: 5, kind: input, shape index: {}]   ;;  %s1285_s6 = inlined_call_operand.vmem [shape: f32[1,32], index: 6, kind: input, shape index: {}]   ;;  %s1286_s7 = inlined_call_operand.vmem [shape: f32[32,128], index: 7, kind: input, shape index: {}]   ;;  %s1287_s8 = inlined_call_operand.vmem [shape: f32[1,128], index: 8, kind: input, shape index: {}]   ;;  %s1288_s9 = inlined_call_operand.vmem [shape: f32[128,64], index: 9, kind: input, shape index: {}]   ;;  %s1289_s10 = inlined_call_operand.vmem [shape: f32[1,64], index: 10, kind: input, shape index: {}]   ;;  %s1290_s11 = inlined_call_operand.vmem [shape: f32[64,6], index: 11, kind: input, shape index: {}]   ;;  %s1291_s12 = inlined_call_operand.vmem [shape: f32[1,6], index: 12, kind: input, shape index: {}]   ;;  %s1292_s13 = inlined_call_operand.vmem [shape: f32[64,2], index: 13, kind: output, shape index: {0}]   ;;  %s1293_s14 = inlined_call_operand.vmem [shape: f32[64,4], index: 14, kind: output, shape index: {1}]   ;;  %s1294_s15 = inlined_call_operand.vmem [shape: f32[64,2], index: 15, kind: output, shape index: {2}]  }
   0x1   :  { %818 = vset.pattern.permute.xlu1 %v825_v0  ;;  %817 = vset.pattern.permute.xlu0 %v825_v0  ;;  %v142_v1 = vld [vmem:[%s1279_s1 + $0x10] sm:$0xff]  ;;  %v140_v2 = vld [vmem:[%s1279_s1] sm:$0xff]  ;;  %v143_v7 = vld [vmem:[%s1279_s1 + $0x18] sm:$0xff]  ;;  %vm197_vm2 = vcmask 64512   ;;  %v826_v20 = vmov 0.0   ;;  %vm279_vm11 = vcmask 261120  }
   0x2   :  { %155 = vperm.xlu1 %818, %v142_v1   ;;  %149 = vperm.xlu0 %817, %v140_v2   ;;  %v144_v3 = vld [vmem:[%s1279_s1 + $0x20] sm:$0xff]  ;;  %v141_v8 = vld [vmem:[%s1279_s1 + $0x8] sm:$0xff]  ;;  %v147_v10 = vld [vmem:[%s1279_s1 + $0x38] sm:$0xff]  ;;  %v139_v16 = vand.u32 127, %v138_v13  ;;  %vm515_vm12 = vcmask 523264   ;;  %vm613_vm13 = vcmask 15360  }
   0x3   :  { %819 = vset.pattern.permute.xlu2 %v825_v0  ;;  %v55_v4 = vld [vmem:[%s1280_s2] sm:$0xf]  ;;  %v145_v9 = vld [vmem:[%s1279_s1 + $0x28] sm:$0xff]  ;;  %v146_v11 = vld [vmem:[%s1279_s1 + $0x30] sm:$0xff] }
   0x4   :  { %161 = vperm.xlu2 %819, %v144_v3   ;;  %762 = vmatpush.msk.msra.mxu0 %vm85_vm0, %v55_v4  ;;  %v924_v5 = vld [vmem:[%s1281_s0] sm:$0xff]  ;;  %v956_v14 = vld [vmem:[%s1281_s0 + $0x8] sm:$0xff]  ;;  %v970_v18 = vld [vmem:[%s1281_s0 + $0x10] sm:$0xff] }
   0x5   :  { %v929_v6 = vld [vmem:[%s1281_s0 + $0x20] sm:$0xff]  ;;  %811 = vmatpush.msk.msra.mxu2 %vm85_vm0, %v55_v4  ;;  %763 = vmatmul.msk.f32.vlgmr.msra.gmra.mxu0 %vm60_vm1, %v924_v5  ;;  %v961_v15 = vld [vmem:[%s1281_s0 + $0x28] sm:$0xff]  ;;  %v975_v19 = vld [vmem:[%s1281_s0 + $0x30] sm:$0xff] }
   0x6   :  { %767 = vmatmul.msk.f32.vlgmr.msra.gmra.mxu2 %vm60_vm1, %v929_v6  ;;  %v196_v12 = vld [vmem:[%s1283_s4] sm:$0xff]  ;;  %v985_v23 = vld [vmem:[%s1281_s0 + $0x18] sm:$0xff]  ;;  %v273_v27 = vld [vmem:[%s1284_s5 + $0x10] sm:$0xff] }
   0x7   :  { %237 = vmatpush.msra.mxu1 %v196_v12  ;;  %812 = vmatpush.msra.mxu3 %v196_v12  ;;  %v990_v24 = vld [vmem:[%s1281_s0 + $0x38] sm:$0xff]  ;;  %v272_v28 = vld [vmem:[%s1284_s5 + $0x8] sm:$0xff]  ;;  %v271_v29 = vld [vmem:[%s1284_s5] sm:$0xff]  ;;  %s828_s0 = smov 126  }
   0x8   :  { %v274_v26 = vld [vmem:[%s1284_s5 + $0x18] sm:$0xff]  ;;  %v820_v43 = vld [vmem:[%s1282_s3] ss:$0 sm:$0xff] }
   0x9   :  { %316 = vmatpush.msrb.mxu2 %v274_v26  ;;  %v356_v4 = vld [vmem:[%s1286_s7 + $0x18] sm:$0xff] }
   0xa   :  { %158 = vperm.xlu1 %818, %v143_v7   ;;  %152 = vperm.xlu0 %817, %v141_v8   ;;  %v355_v7 = vld [vmem:[%s1286_s7 + $0x10] sm:$0xff]  ;;  %v354_v8 = vld [vmem:[%s1286_s7 + $0x8] sm:$0xff] }
   0xb   :  { %317 = vmatpush.msrb.mxu2 %v273_v27  ;;  %397 = vmatpush.msrb.mxu3 %v356_v4 }
   0xc   :  { %164 = vperm.xlu2 %819, %v145_v9  }
   0xd   :  { %764 = vmatmul.msk.f32.gmra.mxu0 %vm60_vm1, %v956_v14  ;;  %318 = vmatpush.msrb.mxu2 %v272_v28 }
   0xe   :  { %768 = vmatmul.msk.f32.gmra.mxu2 %vm60_vm1, %v961_v15  ;;  %398 = vmatpush.msrb.mxu3 %v355_v7 }
   0xf   :  { %319 = vmatpush.msrb.mxu2 %v271_v29 }
  0x10   :  { %399 = vmatpush.msrb.mxu3 %v354_v8  ;;  %v435_v8 = vld [vmem:[%s1288_s9 + $0x8] sm:$0xff] }
  0x12   :  { %170 = vperm.xlu1 %818, %v147_v10   ;;  %167 = vperm.xlu0 %817, %v146_v11   ;;  %v353_v10 = vld [vmem:[%s1286_s7] sm:$0xff] }
  0x13   :  { %400 = vmatpush.msrb.mxu3 %v353_v10  ;;  %v822_v10 = vld [vmem:[%s1287_s8] ss:$0 sm:$0xff] }
  0x15   :  { %765 = vmatmul.msk.f32.gmra.mxu0 %vm60_vm1, %v970_v18 }
  0x16   :  { %769 = vmatmul.msk.f32.gmra.mxu2 %vm60_vm1, %v975_v19 }
  0x1d   :  { %766 = vmatmul.msk.f32.gmra.mxu0 %vm60_vm1, %v985_v23 }
  0x1e   :  { %770 = vmatmul.msk.f32.gmra.mxu2 %vm60_vm1, %v990_v24 }
  0x5e   :  { %v162_v17 = vpop.permute.xlu2 %161 }
  0x5f   :  { %vm176_vm3 = vcmp.eq.s32.totalorder %v139_v16, %v162_v17 }
  0x60   :  { %v775_v21 = vsel %vm176_vm3, 1.0, %v826_v20 }
  0x61   :  { %783 = vmatmul.msk.f32.vlgmr.msra.gmra.mxu3 %vm197_vm2, %v775_v21 }
  0x66   :  { %v165_v22 = vpop.permute.xlu2 %164 }
  0x67   :  { %vm177_vm4 = vcmp.eq.s32.totalorder %v139_v16, %v165_v22 }
  0x68   :  { %v776_v25 = vsel %vm177_vm4, 1.0, %v826_v20 }
  0x69   :  { %784 = vmatmul.msk.f32.gmra.mxu3 %vm197_vm2, %v776_v25 }
  0x74   :  { %v156_v30 = vpop.permute.xlu1 %155  ;;  %v150_v31 = vpop.permute.xlu0 %149 }
  0x75   :  { %vm172_vm5 = vcmp.eq.s32.totalorder %v139_v16, %v150_v31  ;;  %vm174_vm7 = vcmp.eq.s32.totalorder %v139_v16, %v156_v30  ;;  %v821_v31 = vld [vmem:[%s1285_s6] ss:$0 sm:$0xff] }
  0x76   :  { %v771_v32 = vsel %vm172_vm5, 1.0, %v826_v20  ;;  %v773_v36 = vsel %vm174_vm7, 1.0, %v826_v20 }
  0x77   :  { %779 = vmatmul.msk.f32.vlgmr.msra.gmra.mxu1 %vm197_vm2, %v771_v32 }
  0x7c   :  { %v153_v33 = vpop.permute.xlu0 %152  ;;  %v159_v34 = vpop.permute.xlu1 %158 }
  0x7d   :  { %vm173_vm6 = vcmp.eq.s32.totalorder %v139_v16, %v153_v33  ;;  %vm175_vm9 = vcmp.eq.s32.totalorder %v139_v16, %v159_v34 }
  0x7e   :  { %v772_v35 = vsel %vm173_vm6, 1.0, %v826_v20  ;;  %v774_v40 = vsel %vm175_vm9, 1.0, %v826_v20 }
  0x7f   :  { %780 = vmatmul.msk.f32.gmra.mxu1 %vm197_vm2, %v772_v35 }
  0x82   :  { %v106_v42 = vpop.f32.mrf.mxu0 }
  0x83   :  { %v107_v44 = vadd.f32 %v820_v43, %v106_v42 }
  0x84   :  { %v168_v37 = vpop.permute.xlu0 %167  ;;  %v171_v39 = vpop.permute.xlu1 %170 }
  0x85   :  { %vm178_vm8 = vcmp.eq.s32.totalorder %v139_v16, %v168_v37  ;;  %vm179_vm10 = vcmp.eq.s32.totalorder %v139_v16, %v171_v39  ;;  %v130_v46 = vmax.f32 %v107_v44, 0.0  ;;  %v449_v44 = vld [vmem:[%s1288_s9 + $0x78] sm:$0xff] }
  0x86   :  { %v777_v38 = vsel %vm178_vm8, 1.0, %v826_v20  ;;  %v778_v41 = vsel %vm179_vm10, 1.0, %v826_v20  ;;  %454 = vmatpush.msrb.mxu0 %v449_v44 }
  0x87   :  { %781 = vmatmul.msk.f32.gmra.mxu1 %vm197_vm2, %v773_v36  ;;  %785 = vmatmul.msk.f32.gmra.mxu3 %vm197_vm2, %v777_v38 }
  0x89   :  { %v118_v57 = vpop.f32.mrf.mxu2 }
  0x8a   :  { %v109_v45 = vpop.f32.mrf.mxu0  ;;  %v119_v62 = vadd.f32 %v820_v43, %v118_v57 }
  0x8b   :  { %v110_v49 = vadd.f32 %v820_v43, %v109_v45  ;;  %v448_v45 = vld [vmem:[%s1288_s9 + $0x70] sm:$0xff] }
  0x8c   :  { %v134_v3 = vmax.f32 %v119_v62, 0.0  ;;  %455 = vmatpush.msrb.mxu0 %v448_v45 }
  0x8d   :  { %v131_v51 = vmax.f32 %v110_v49, 0.0  ;;  %v446_v49 = vld [vmem:[%s1288_s9 + $0x60] sm:$0xff] }
  0x8f   :  { %782 = vmatmul.msk.f32.gmra.mxu1 %vm197_vm2, %v774_v40  ;;  %786 = vmatmul.msk.f32.gmra.mxu3 %vm197_vm2, %v778_v41 }
  0x91   :  { %v121_v2 = vpop.f32.mrf.mxu2 }
  0x92   :  { %v112_v50 = vpop.f32.mrf.mxu0  ;;  %v122_v11 = vadd.f32 %v820_v43, %v121_v2  ;;  %v436_v2 = vld [vmem:[%s1288_s9 + $0x10] sm:$0xff] }
  0x93   :  { %v113_v54 = vadd.f32 %v820_v43, %v112_v50 }
  0x94   :  { %v135_v16 = vmax.f32 %v122_v11, 0.0 }
  0x95   :  { %v132_v55 = vmax.f32 %v113_v54, 0.0 }
  0x99   :  { %v124_v13 = vpop.f32.mrf.mxu2 }
  0x9a   :  { %v115_v56 = vpop.f32.mrf.mxu0  ;;  %v125_v20 = vadd.f32 %v820_v43, %v124_v13 }
  0x9b   :  { %v116_v60 = vadd.f32 %v820_v43, %v115_v56  ;;  %v442_v56 = vld [vmem:[%s1288_s9 + $0x40] sm:$0xff] }
  0x9c   :  { %v136_v22 = vmax.f32 %v125_v20, 0.0 }
  0x9d   :  { %v133_v61 = vmax.f32 %v116_v60, 0.0  ;;  %v439_v60 = vld [vmem:[%s1288_s9 + $0x28] sm:$0xff] }
  0xa1   :  { %v127_v25 = vpop.f32.mrf.mxu2 }
  0xa2   :  { %v128_v27 = vadd.f32 %v820_v43, %v127_v25 }
  0xa4   :  { %v137_v28 = vmax.f32 %v128_v27, 0.0 }
  0xe4   :  { %v251_v63 = vpop.f32.mrf.mxu3 }
  0xe5   :  { %v267_v9 = vadd.f32 %v251_v63, %v134_v3  ;;  %v438_v63 = vld [vmem:[%s1288_s9 + $0x20] sm:$0xff] }
  0xec   :  { %v254_v12 = vpop.f32.mrf.mxu3 }
  0xed   :  { %v268_v17 = vadd.f32 %v254_v12, %v135_v16 }
  0xf4   :  { %v239_v47 = vpop.f32.mrf.mxu1 }
  0xf5   :  { %v263_v48 = vadd.f32 %v239_v47, %v130_v46  ;;  %v447_v46 = vld [vmem:[%s1288_s9 + $0x68] sm:$0xff] }
  0xf6   :  { %456 = vmatpush.msrb.mxu0 %v447_v46 }
  0xf7   :  { %787 = vmatmul.msk.f32.vlgmr.msrb.gmra.mxu2 %vm279_vm11, %v263_v48 }
  0xf8   :  { %457 = vmatpush.msrb.mxu0 %v446_v49 }
  0xfc   :  { %v242_v52 = vpop.f32.mrf.mxu1 }
  0xfd   :  { %v264_v53 = vadd.f32 %v242_v52, %v131_v51  ;;  %v445_v51 = vld [vmem:[%s1288_s9 + $0x58] sm:$0xff]  ;;  %v444_v52 = vld [vmem:[%s1288_s9 + $0x50] sm:$0xff] }
  0xfe   :  { %458 = vmatpush.msrb.mxu0 %v445_v51 }
  0xff   :  { %788 = vmatmul.msk.f32.gmra.mxu2 %vm279_vm11, %v264_v53  ;;  %v443_v53 = vld [vmem:[%s1288_s9 + $0x48] sm:$0xff] }
 0x100   :  { %459 = vmatpush.msrb.mxu0 %v444_v52 }
 0x102   :  { %460 = vmatpush.msrb.mxu0 %v443_v53 }
 0x104   :  { %v245_v58 = vpop.f32.mrf.mxu1  ;;  %461 = vmatpush.msrb.mxu0 %v442_v56 }
 0x105   :  { %v265_v59 = vadd.f32 %v245_v58, %v132_v55  ;;  %v441_v58 = vld [vmem:[%s1288_s9 + $0x38] sm:$0xff] }
 0x106   :  { %462 = vmatpush.msrb.mxu0 %v441_v58 }
 0x107   :  { %789 = vmatmul.msk.f32.gmra.mxu2 %vm279_vm11, %v265_v59  ;;  %v440_v59 = vld [vmem:[%s1288_s9 + $0x30] sm:$0xff] }
 0x108   :  { %463 = vmatpush.msrb.mxu0 %v440_v59 }
 0x10a   :  { %v257_v21 = vpop.f32.mrf.mxu3  ;;  %464 = vmatpush.msrb.mxu0 %v439_v60 }
 0x10b   :  { %v269_v26 = vadd.f32 %v257_v21, %v136_v22 }
 0x10c   :  { %v248_v0 = vpop.f32.mrf.mxu1  ;;  %465 = vmatpush.msrb.mxu0 %v438_v63 }
 0x10d   :  { %v266_v1 = vadd.f32 %v248_v0, %v133_v61 }
 0x10f   :  { %790 = vmatmul.msk.f32.gmra.mxu2 %vm279_vm11, %v266_v1  ;;  %v437_v1 = vld [vmem:[%s1288_s9 + $0x18] sm:$0xff] }
 0x110   :  { %466 = vmatpush.msrb.mxu0 %v437_v1 }
 0x112   :  { %v260_v29 = vpop.f32.mrf.mxu3  ;;  %467 = vmatpush.msrb.mxu0 %v436_v2  ;;  %v824_v2 = vld [vmem:[%s1291_s12] ss:$0 sm:$0xff] }
 0x113   :  { %v270_v30 = vadd.f32 %v260_v29, %v137_v28  ;;  %v510_v29 = vld [vmem:[%s1290_s11 + $0x38] sm:$0xff] }
 0x114   :  { %468 = vmatpush.msrb.mxu0 %v435_v8  ;;  %548 = vmatpush.msrb.mxu1 %v510_v29 }
 0x117   :  { %791 = vmatmul.msk.f32.gmra.mxu2 %vm279_vm11, %v267_v9  ;;  %v434_v9 = vld [vmem:[%s1288_s9] sm:$0xff]  ;;  %s827_s9 = smov 2  }
 0x118   :  { %469 = vmatpush.msrb.mxu0 %v434_v9  ;;  %583 = vrot.lane.b32.xlu0 %v956_v14, %s827_s9  ;;  %v508_v14 = vld [vmem:[%s1290_s11 + $0x28] sm:$0xff] }
 0x119   :  { %585 = vrot.lane.b32.xlu1 %v970_v18, %s827_s9  ;;  %581 = vrot.lane.b32.xlu2 %v924_v5, %s827_s9  ;;  %v505_v5 = vld [vmem:[%s1290_s11 + $0x10] sm:$0xff] }
 0x11f   :  { %792 = vmatmul.msk.f32.gmra.mxu2 %vm279_vm11, %v268_v17 }
 0x120   :  { %589 = vrot.lane.b32.xlu0 %v929_v6, %s827_s9 }
 0x121   :  { %591 = vrot.lane.b32.xlu1 %v961_v15, %s827_s9  ;;  %587 = vrot.lane.b32.xlu2 %v985_v23, %s827_s9 }
 0x127   :  { %793 = vmatmul.msk.f32.gmra.mxu2 %vm279_vm11, %v269_v26 }
 0x128   :  { %595 = vrot.lane.b32.xlu0 %v990_v24, %s827_s9  ;;  %v823_v24 = vld [vmem:[%s1289_s10] ss:$0 sm:$0xff] }
 0x129   :  { %593 = vrot.lane.b32.xlu2 %v975_v19, %s827_s9 }
 0x12f   :  { %794 = vmatmul.msk.f32.gmra.mxu2 %vm279_vm11, %v270_v30  ;;  %v509_v30 = vld [vmem:[%s1290_s11 + $0x30] sm:$0xff] }
 0x130   :  { %549 = vmatpush.msrb.mxu1 %v509_v30 }
 0x132   :  { %550 = vmatpush.msrb.mxu1 %v508_v14 }
 0x17a   :  { %v321_v32 = vpop.f32.mrf.mxu2 }
 0x17b   :  { %v322_v33 = vadd.f32 %v821_v31, %v321_v32  ;;  %v507_v32 = vld [vmem:[%s1290_s11 + $0x20] sm:$0xff] }
 0x17c   :  { %551 = vmatpush.msrb.mxu1 %v507_v32 }
 0x17d   :  { %v345_v34 = vmax.f32 %v322_v33, 0.0 }
 0x17f   :  { %795 = vmatmul.msk.f32.vlgmr.msrb.gmra.mxu3 %vm279_vm11, %v345_v34  ;;  %v506_v34 = vld [vmem:[%s1290_s11 + $0x18] sm:$0xff] }
 0x180   :  { %552 = vmatpush.msrb.mxu1 %v506_v34 }
 0x182   :  { %v324_v35 = vpop.f32.mrf.mxu2  ;;  %553 = vmatpush.msrb.mxu1 %v505_v5 }
 0x183   :  { %v325_v36 = vadd.f32 %v821_v31, %v324_v35  ;;  %v504_v35 = vld [vmem:[%s1290_s11 + $0x8] sm:$0xff] }
 0x184   :  { %554 = vmatpush.msrb.mxu1 %v504_v35 }
 0x185   :  { %v346_v37 = vmax.f32 %v325_v36, 0.0 }
 0x187   :  { %796 = vmatmul.msk.f32.gmra.mxu3 %vm279_vm11, %v346_v37 }
 0x18a   :  { %v327_v38 = vpop.f32.mrf.mxu2 }
 0x18b   :  { %v328_v39 = vadd.f32 %v821_v31, %v327_v38 }
 0x18d   :  { %v347_v40 = vmax.f32 %v328_v39, 0.0 }
 0x18f   :  { %797 = vmatmul.msk.f32.gmra.mxu3 %vm279_vm11, %v347_v40 }
 0x192   :  { %v330_v41 = vpop.f32.mrf.mxu2 }
 0x193   :  { %v331_v42 = vadd.f32 %v821_v31, %v330_v41 }
 0x195   :  { %v348_v43 = vmax.f32 %v331_v42, 0.0  ;;  %v503_v42 = vld [vmem:[%s1290_s11] sm:$0xff] }
 0x196   :  { %555 = vmatpush.msrb.mxu1 %v503_v42 }
 0x197   :  { %798 = vmatmul.msk.f32.gmra.mxu3 %vm279_vm11, %v348_v43 }
 0x19a   :  { %v333_v47 = vpop.f32.mrf.mxu2 }
 0x19b   :  { %v334_v48 = vadd.f32 %v821_v31, %v333_v47 }
 0x19d   :  { %v349_v50 = vmax.f32 %v334_v48, 0.0 }
 0x19f   :  { %799 = vmatmul.msk.f32.gmra.mxu3 %vm279_vm11, %v349_v50 }
 0x1a2   :  { %v336_v54 = vpop.f32.mrf.mxu2 }
 0x1a3   :  { %v337_v55 = vadd.f32 %v821_v31, %v336_v54 }
 0x1a5   :  { %v350_v57 = vmax.f32 %v337_v55, 0.0 }
 0x1a7   :  { %800 = vmatmul.msk.f32.gmra.mxu3 %vm279_vm11, %v350_v57 }
 0x1aa   :  { %v339_v61 = vpop.f32.mrf.mxu2 }
 0x1ab   :  { %v340_v62 = vadd.f32 %v821_v31, %v339_v61 }
 0x1ad   :  { %v351_v0 = vmax.f32 %v340_v62, 0.0 }
 0x1af   :  { %801 = vmatmul.msk.f32.gmra.mxu3 %vm279_vm11, %v351_v0 }
 0x1b2   :  { %v342_v3 = vpop.f32.mrf.mxu2 }
 0x1b3   :  { %v343_v4 = vadd.f32 %v821_v31, %v342_v3 }
 0x1b5   :  { %v352_v7 = vmax.f32 %v343_v4, 0.0  ;;  %v582_v4 = vpop.permute.xlu2 %581 }
 0x1b7   :  { %802 = vmatmul.msk.f32.gmra.mxu3 %vm279_vm11, %v352_v7 }
 0x202   :  { %v402_v11 = vpop.f32.mrf.mxu3 }
 0x203   :  { %v403_v12 = vadd.f32 %v822_v10, %v402_v11  ;;  %v584_v11 = vpop.permute.xlu0 %583 }
 0x205   :  { %v426_v13 = vmax.f32 %v403_v12, 0.0 }
 0x207   :  { %470 = vmatmul.f32.vlgmr.msrb.gmra.mxu0 %v426_v13 }
 0x20a   :  { %v405_v16 = vpop.f32.mrf.mxu3 }
 0x20b   :  { %v406_v17 = vadd.f32 %v822_v10, %v405_v16 }
 0x20d   :  { %v427_v20 = vmax.f32 %v406_v17, 0.0 }
 0x20f   :  { %473 = vmatmul.f32.gmra.mxu0 %v427_v20  ;;  %v586_v20 = vpop.permute.xlu1 %585 }
 0x212   :  { %v408_v21 = vpop.f32.mrf.mxu3 }
 0x213   :  { %v409_v22 = vadd.f32 %v822_v10, %v408_v21 }
 0x215   :  { %v428_v25 = vmax.f32 %v409_v22, 0.0 }
 0x217   :  { %476 = vmatmul.f32.gmra.mxu0 %v428_v25  ;;  %v592_v5 = vpop.permute.xlu1 %591 }
 0x21a   :  { %v411_v26 = vpop.f32.mrf.mxu3 }
 0x21b   :  { %v412_v27 = vadd.f32 %v822_v10, %v411_v26 }
 0x21d   :  { %v429_v28 = vmax.f32 %v412_v27, 0.0  ;;  %v588_v27 = vpop.permute.xlu2 %587 }
 0x21f   :  { %479 = vmatmul.f32.gmra.mxu0 %v429_v28 }
 0x222   :  { %v414_v31 = vpop.f32.mrf.mxu3 }
 0x223   :  { %v415_v18 = vadd.f32 %v822_v10, %v414_v31  ;;  %v590_v31 = vpop.permute.xlu0 %589 }
 0x225   :  { %v430_v33 = vmax.f32 %v415_v18, 0.0 }
 0x227   :  { %482 = vmatmul.f32.gmra.mxu0 %v430_v33 }
 0x22a   :  { %v417_v36 = vpop.f32.mrf.mxu3 }
 0x22b   :  { %v418_v37 = vadd.f32 %v822_v10, %v417_v36 }
 0x22d   :  { %v431_v6 = vmax.f32 %v418_v37, 0.0 }
 0x22f   :  { %485 = vmatmul.f32.gmra.mxu0 %v431_v6 }
 0x232   :  { %v420_v15 = vpop.f32.mrf.mxu3 }
 0x233   :  { %v421_v38 = vadd.f32 %v822_v10, %v420_v15  ;;  %v594_v15 = vpop.permute.xlu2 %593 }
 0x235   :  { %v432_v39 = vmax.f32 %v421_v38, 0.0 }
 0x237   :  { %488 = vmatmul.f32.gmra.mxu0 %v432_v39 }
 0x23a   :  { %v423_v23 = vpop.f32.mrf.mxu3 }
 0x23b   :  { %v424_v40 = vadd.f32 %v822_v10, %v423_v23 }
 0x23d   :  { %v433_v41 = vmax.f32 %v424_v40, 0.0 }
 0x23f   :  { %491 = vmatmul.f32.gmra.mxu0 %v433_v41  ;;  %v596_v41 = vpop.permute.xlu0 %595 }
 0x284   :  { %v471_v43 = vpop.f32.mrf.mxu0 }
 0x285   :  { %v472_v44 = vadd.f32 %v823_v24, %v471_v43 }
 0x287   :  { %v495_v19 = vmax.f32 %v472_v44, 0.0 }
 0x289   :  { %803 = vmatmul.msk.f32.vlgmr.msrb.gmra.mxu1 %vm515_vm12, %v495_v19 }
 0x28c   :  { %v474_v45 = vpop.f32.mrf.mxu0 }
 0x28d   :  { %v475_v46 = vadd.f32 %v823_v24, %v474_v45 }
 0x28f   :  { %v496_v47 = vmax.f32 %v475_v46, 0.0 }
 0x291   :  { %804 = vmatmul.msk.f32.gmra.mxu1 %vm515_vm12, %v496_v47 }
 0x294   :  { %v477_v48 = vpop.f32.mrf.mxu0 }
 0x295   :  { %v478_v49 = vadd.f32 %v823_v24, %v477_v48 }
 0x297   :  { %v497_v50 = vmax.f32 %v478_v49, 0.0 }
 0x299   :  { %805 = vmatmul.msk.f32.gmra.mxu1 %vm515_vm12, %v497_v50 }
 0x29c   :  { %v480_v51 = vpop.f32.mrf.mxu0 }
 0x29d   :  { %v481_v52 = vadd.f32 %v823_v24, %v480_v51 }
 0x29f   :  { %v498_v53 = vmax.f32 %v481_v52, 0.0 }
 0x2a1   :  { %806 = vmatmul.msk.f32.gmra.mxu1 %vm515_vm12, %v498_v53 }
 0x2a4   :  { %v483_v54 = vpop.f32.mrf.mxu0 }
 0x2a5   :  { %v484_v55 = vadd.f32 %v823_v24, %v483_v54 }
 0x2a7   :  { %v499_v56 = vmax.f32 %v484_v55, 0.0 }
 0x2a9   :  { %807 = vmatmul.msk.f32.gmra.mxu1 %vm515_vm12, %v499_v56 }
 0x2ac   :  { %v486_v57 = vpop.f32.mrf.mxu0 }
 0x2ad   :  { %v487_v58 = vadd.f32 %v823_v24, %v486_v57 }
 0x2af   :  { %v500_v59 = vmax.f32 %v487_v58, 0.0 }
 0x2b1   :  { %808 = vmatmul.msk.f32.gmra.mxu1 %vm515_vm12, %v500_v59 }
 0x2b4   :  { %v489_v60 = vpop.f32.mrf.mxu0 }
 0x2b5   :  { %v490_v61 = vadd.f32 %v823_v24, %v489_v60 }
 0x2b7   :  { %v501_v62 = vmax.f32 %v490_v61, 0.0 }
 0x2b9   :  { %809 = vmatmul.msk.f32.gmra.mxu1 %vm515_vm12, %v501_v62 }
 0x2bc   :  { %v492_v63 = vpop.f32.mrf.mxu0 }
 0x2bd   :  { %v493_v0 = vadd.f32 %v823_v24, %v492_v63 }
 0x2bf   :  { %v502_v1 = vmax.f32 %v493_v0, 0.0 }
 0x2c1   :  { %810 = vmatmul.msk.f32.gmra.mxu1 %vm515_vm12, %v502_v1 }
 0x306   :  { %v557_v3 = vpop.f32.mrf.mxu1 }
 0x307   :  { %v558_v7 = vadd.f32 %v824_v2, %v557_v3 }
 0x309   :  { %614 = vst.msk [vmem:[%s1292_s13] sm:$0xff] %vm613_vm13, %v558_v7  ;;  %v1158_v8 = vadd.f32 %v582_v4, %v558_v7 }
 0x30b   :  { %v662_v9 = vmul.f32 0.5, %v1158_v8 }
 0x30d   :  { %678 = vrot.lane.b32.xlu1 %v662_v9, %s828_s0 }
 0x30e   :  { %v560_v10 = vpop.f32.mrf.mxu1 }
 0x30f   :  { %v561_v12 = vadd.f32 %v824_v2, %v560_v10 }
 0x311   :  { %615 = vst.msk [vmem:[%s1292_s13 + $0x8] sm:$0xff] %vm613_vm13, %v561_v12  ;;  %v606_v13 = vadd.f32 %v584_v11, %v561_v12 }
 0x313   :  { %v663_v16 = vmul.f32 0.5, %v606_v13 }
 0x315   :  { %680 = vrot.lane.b32.xlu2 %v663_v16, %s828_s0 }
 0x316   :  { %v563_v17 = vpop.f32.mrf.mxu1 }
 0x317   :  { %v564_v21 = vadd.f32 %v824_v2, %v563_v17 }
 0x319   :  { %616 = vst.msk [vmem:[%s1292_s13 + $0x10] sm:$0xff] %vm613_vm13, %v564_v21  ;;  %v607_v22 = vadd.f32 %v586_v20, %v564_v21 }
 0x31b   :  { %v664_v25 = vmul.f32 0.5, %v607_v22 }
 0x31d   :  { %682 = vrot.lane.b32.xlu0 %v664_v25, %s828_s0 }
 0x31e   :  { %v566_v26 = vpop.f32.mrf.mxu1 }
 0x31f   :  { %v567_v28 = vadd.f32 %v824_v2, %v566_v26 }
 0x321   :  { %617 = vst.msk [vmem:[%s1292_s13 + $0x18] sm:$0xff] %vm613_vm13, %v567_v28  ;;  %v608_v29 = vadd.f32 %v588_v27, %v567_v28 }
 0x323   :  { %v665_v30 = vmul.f32 0.5, %v608_v29 }
 0x325   :  { %684 = vrot.lane.b32.xlu1 %v665_v30, %s828_s0 }
 0x326   :  { %v569_v14 = vpop.f32.mrf.mxu1 }
 0x327   :  { %v570_v18 = vadd.f32 %v824_v2, %v569_v14 }
 0x329   :  { %618 = vst.msk [vmem:[%s1292_s13 + $0x20] sm:$0xff] %vm613_vm13, %v570_v18  ;;  %v609_v32 = vadd.f32 %v590_v31, %v570_v18 }
 0x32b   :  { %v666_v33 = vmul.f32 0.5, %v609_v32 }
 0x32d   :  { %686 = vrot.lane.b32.xlu2 %v666_v33, %s828_s0 }
 0x32e   :  { %v572_v34 = vpop.f32.mrf.mxu1 }
 0x32f   :  { %v573_v35 = vadd.f32 %v824_v2, %v572_v34 }
 0x331   :  { %619 = vst.msk [vmem:[%s1292_s13 + $0x28] sm:$0xff] %vm613_vm13, %v573_v35  ;;  %v610_v36 = vadd.f32 %v592_v5, %v573_v35 }
 0x333   :  { %v667_v37 = vmul.f32 0.5, %v610_v36 }
 0x335   :  { %688 = vrot.lane.b32.xlu0 %v667_v37, %s828_s0 }
 0x336   :  { %v575_v6 = vpop.f32.mrf.mxu1 }
 0x337   :  { %v576_v38 = vadd.f32 %v824_v2, %v575_v6 }
 0x339   :  { %620 = vst.msk [vmem:[%s1292_s13 + $0x30] sm:$0xff] %vm613_vm13, %v576_v38  ;;  %v611_v39 = vadd.f32 %v594_v15, %v576_v38 }
 0x33b   :  { %v668_v23 = vmul.f32 0.5, %v611_v39 }
 0x33d   :  { %630 = vrot.lane.b32.xlu0 %v1158_v8, %s828_s0  ;;  %690 = vrot.lane.b32.xlu1 %v668_v23, %s828_s0 }
 0x33e   :  { %v578_v40 = vpop.f32.mrf.mxu1 }
 0x33f   :  { %v579_v42 = vadd.f32 %v824_v2, %v578_v40 }
 0x341   :  { %621 = vst.msk [vmem:[%s1292_s13 + $0x38] sm:$0xff] %vm613_vm13, %v579_v42  ;;  %v612_v24 = vadd.f32 %v596_v41, %v579_v42 }
 0x343   :  { %v669_v43 = vmul.f32 0.5, %v612_v24 }
 0x345   :  { %692 = vrot.lane.b32.xlu2 %v669_v43, %s828_s0  ;;  %636 = vrot.lane.b32.xlu0 %v608_v29, %s828_s0 }
 0x346   :  { %632 = vrot.lane.b32.xlu1 %v606_v13, %s828_s0 }
 0x34d   :  { %634 = vrot.lane.b32.xlu2 %v607_v22, %s828_s0  ;;  %642 = vrot.lane.b32.xlu0 %v611_v39, %s828_s0 }
 0x34e   :  { %638 = vrot.lane.b32.xlu1 %v609_v32, %s828_s0 }
 0x355   :  { %640 = vrot.lane.b32.xlu2 %v610_v36, %s828_s0 }
 0x356   :  { %644 = vrot.lane.b32.xlu1 %v612_v24, %s828_s0 }
 0x36f   :  { %v681_v44 = vpop.permute.xlu2 %680 }
 0x370   :  { %v703_v19 = vadd.f32 %v681_v44, %v606_v13 }
 0x372   :  { %720 = vrot.lane.b32.xlu0 %v703_v19, %s828_s0 }
 0x37f   :  { %v679_v45 = vpop.permute.xlu1 %678 }
 0x380   :  { %v702_v46 = vadd.f32 %v679_v45, %v1158_v8 }
 0x382   :  { %718 = vrot.lane.b32.xlu2 %v702_v46, %s828_s0 }
 0x387   :  { %v687_v47 = vpop.permute.xlu2 %686 }
 0x388   :  { %v706_v48 = vadd.f32 %v687_v47, %v609_v32 }
 0x38a   :  { %726 = vrot.lane.b32.xlu0 %v706_v48, %s828_s0 }
 0x38f   :  { %v683_v49 = vpop.permute.xlu0 %682 }
 0x390   :  { %v704_v50 = vadd.f32 %v683_v49, %v607_v22 }
 0x392   :  { %722 = vrot.lane.b32.xlu1 %v704_v50, %s828_s0 }
 0x397   :  { %v685_v51 = vpop.permute.xlu1 %684 }
 0x398   :  { %v705_v52 = vadd.f32 %v685_v51, %v608_v29 }
 0x39a   :  { %724 = vrot.lane.b32.xlu2 %v705_v52, %s828_s0 }
 0x39f   :  { %v693_v53 = vpop.permute.xlu2 %692 }
 0x3a0   :  { %v709_v54 = vadd.f32 %v693_v53, %v612_v24 }
 0x3a2   :  { %732 = vrot.lane.b32.xlu0 %v709_v54, %s828_s0 }
 0x3a7   :  { %v689_v55 = vpop.permute.xlu0 %688  ;;  %v635_v56 = vpop.permute.xlu2 %634 }
 0x3a8   :  { %v707_v57 = vadd.f32 %v689_v55, %v610_v36  ;;  %656 = vst.msk [vmem:[%s1293_s14 + $0x10] sm:$0xff] %vm60_vm1, %v635_v56 }
 0x3aa   :  { %728 = vrot.lane.b32.xlu1 %v707_v57, %s828_s0 }
 0x3af   :  { %v641_v58 = vpop.permute.xlu2 %640  ;;  %v631_v59 = vpop.permute.xlu0 %630 }
 0x3b0   :  { %659 = vst.msk [vmem:[%s1293_s14 + $0x28] sm:$0xff] %vm60_vm1, %v641_v58  ;;  %v691_v60 = vpop.permute.xlu1 %690 }
 0x3b1   :  { %654 = vst.msk [vmem:[%s1293_s14] sm:$0xff] %vm60_vm1, %v631_v59  ;;  %v708_v61 = vadd.f32 %v691_v60, %v611_v39 }
 0x3b3   :  { %730 = vrot.lane.b32.xlu2 %v708_v61, %s828_s0 }
 0x3b7   :  { %v637_v62 = vpop.permute.xlu0 %636 }
 0x3b8   :  { %657 = vst.msk [vmem:[%s1293_s14 + $0x18] sm:$0xff] %vm60_vm1, %v637_v62  ;;  %v633_v63 = vpop.permute.xlu1 %632 }
 0x3b9   :  { %655 = vst.msk [vmem:[%s1293_s14 + $0x8] sm:$0xff] %vm60_vm1, %v633_v63 }
 0x3bf   :  { %v643_v0 = vpop.permute.xlu0 %642 }
 0x3c0   :  { %660 = vst.msk [vmem:[%s1293_s14 + $0x30] sm:$0xff] %vm60_vm1, %v643_v0  ;;  %v639_v1 = vpop.permute.xlu1 %638 }
 0x3c1   :  { %658 = vst.msk [vmem:[%s1293_s14 + $0x20] sm:$0xff] %vm60_vm1, %v639_v1 }
 0x3c8   :  { %v645_v2 = vpop.permute.xlu1 %644 }
 0x3c9   :  { %661 = vst.msk [vmem:[%s1293_s14 + $0x38] sm:$0xff] %vm60_vm1, %v645_v2 }
 0x3dc   :  { %v719_v3 = vpop.permute.xlu2 %718 }
 0x3dd   :  { %742 = vst.msk [vmem:[%s1294_s15] sm:$0xff] %vm613_vm13, %v719_v3 }
 0x3e4   :  { %v721_v4 = vpop.permute.xlu0 %720 }
 0x3e5   :  { %743 = vst.msk [vmem:[%s1294_s15 + $0x8] sm:$0xff] %vm613_vm13, %v721_v4 }
 0x3f4   :  { %v725_v7 = vpop.permute.xlu2 %724 }
 0x3f5   :  { %745 = vst.msk [vmem:[%s1294_s15 + $0x18] sm:$0xff] %vm613_vm13, %v725_v7 }
 0x3fc   :  { %v727_v8 = vpop.permute.xlu0 %726 }
 0x3fd   :  { %746 = vst.msk [vmem:[%s1294_s15 + $0x20] sm:$0xff] %vm613_vm13, %v727_v8 }
 0x404   :  { %v723_v9 = vpop.permute.xlu1 %722 }
 0x405   :  { %744 = vst.msk [vmem:[%s1294_s15 + $0x10] sm:$0xff] %vm613_vm13, %v723_v9 }
 0x40d   :  { %v731_v10 = vpop.permute.xlu2 %730 }
 0x40e   :  { %748 = vst.msk [vmem:[%s1294_s15 + $0x30] sm:$0xff] %vm613_vm13, %v731_v10 }
 0x414   :  { %v733_v11 = vpop.permute.xlu0 %732 }
 0x415   :  { %749 = vst.msk [vmem:[%s1294_s15 + $0x38] sm:$0xff] %vm613_vm13, %v733_v11 }
 0x41c   :  { %v729_v12 = vpop.permute.xlu1 %728 }
 0x41d   :  { %747 = vst.msk [vmem:[%s1294_s15 + $0x28] sm:$0xff] %vm613_vm13, %v729_v12 }

</bundles_post_ra>
